<compile_context>
chip_gen: v6e
topology: v6e:2x2x1
jax: 0.10.0
libtpu: 0.0.40
codegen_flags: <defaults>
</compile_context>

<pallas_src>
import functools

import jax
import jax.numpy as jnp
from jax.experimental import pallas as pl
from jax.experimental.pallas import tpu as pltpu


def _ln_kernel(x_ref, p_ref, o_ref, *, biasfree):
    x = x_ref[...].astype(jnp.float32)                       # (1, C, T)
    c = x.shape[1]
    inv_c = jnp.float32(1.0 / c)
    # Two-pass stats: mean, then mean of centered squares (no cancellation).
    mu = jnp.sum(x, axis=1, keepdims=True) * inv_c            # (1, 1, T)
    xc = x - mu
    var = jnp.sum(xc * xc, axis=1, keepdims=True) * inv_c     # unbiased=False
    inv = jax.lax.rsqrt(var + jnp.float32(1e-5))
    w = p_ref[0:1, :, :].astype(jnp.float32)                  # (1, C, 1)
    if biasfree:
        # NOTE: BiasFree variant scales x itself (NOT x - mu), matching the
        # torch/Restormer reference; var is still the mean-centered variance.
        y = x * (inv * w)
    else:
        b = p_ref[1:2, :, :].astype(jnp.float32)               # (1, C, 1)
        y = xc * (inv * w) + b
    o_ref[...] = y.astype(o_ref.dtype)
    # TODO(synk): for C < 8 (f32) / C < 16 (bf16) the sublane axis is
    # under-filled; folding lanes into sublanes would halve VMEM waste, but is
    # unnecessary for typical Restormer channel counts (48/96/...).


def _device_params():
    """(target block bytes, VMEM budget cap) per chip generation."""
    try:
        kind = jax.devices()[0].device_kind.lower()
    except Exception:
        kind = ""
    if "v5" in kind:
        # v5e: ~0.82 TB/s HBM -> 1-2 MiB blocks already amortize grid overhead.
        return 2 << 20, 64 << 20
    if "v7" in kind:
        # v7x: fastest HBM (per-step overhead matters most) but only 64 MiB VMEM.
        return 4 << 20, 48 << 20
    # v6e / default.
    return 4 << 20, 64 << 20


def _vmem_need(c, t, itemsize):
    """Double-buffered in+out blocks + in-kernel f32 temporaries + margin."""
    blk_in = c * t * itemsize
    blk_f32 = c * t * 4
    return 4 * blk_in + 4 * blk_f32 + (1 << 20)


def _pick_tile_hw(c, hw, itemsize, b, target_bytes, vmem_cap):
    """Lane-tile size: multiple of 128, sized by bytes, megacore-friendly grid."""
    hw128 = pl.cdiv(hw, 128) * 128
    t_max = (target_bytes // max(1, c * itemsize)) // 128 * 128
    t_max = max(128, min(t_max, hw128, 8192))
    # Keep in/out double buffers + f32 temporaries inside the VMEM budget.
    while t_max > 128 and _vmem_need(c, t_max, itemsize) > vmem_cap:
        t_max -= 128

    def total_steps(t):
        return b * pl.cdiv(hw, t)

    candidates = range(t_max, 127, -128)
    # Prefer >= 8 total steps (>= 4 per v7x TensorCore) with an even count,
    # shrinking the tile (in 128-lane steps) only as far as needed.
    for pred in (lambda n: n >= 8 and n % 2 == 0,
                 lambda n: n >= 8,
                 lambda n: n >= 2 and n % 2 == 0,
                 lambda n: n >= 2):
        for t in candidates:
            if pred(total_steps(t)):
                return t
    return t_max


@functools.partial(jax.jit, static_argnames=("layernorm_type",))
def layernorm_nchw(x, weight, bias, layernorm_type="WithBias"):
    """Equivalent of LayerNorm(dim, LayerNorm_type).forward on NCHW input."""
    b, c, h, w = x.shape
    hw = h * w
    x3 = x.reshape(b, c, hw)                                  # free: contiguous reshape

    target_bytes, vmem_cap = _device_params()
    t = _pick_tile_hw(c, hw, x.dtype.itemsize, b, target_bytes, vmem_cap)
    n_tiles = pl.cdiv(hw, t)   # last block may overhang; Pallas masks OOB stores

    # Pack weight/bias into a single (2, C, 1) parameter array -> one resident DMA.
    params = jnp.stack([weight, bias]).reshape(2, c, 1)

    kernel = functools.partial(_ln_kernel,
                               biasfree=(layernorm_type == "BiasFree"))
    vmem_limit = int(min(vmem_cap,
                         max(32 << 20, _vmem_need(c, t, x.dtype.itemsize))))

    y3 = pl.pallas_call(
        kernel,
        out_shape=jax.ShapeDtypeStruct((b, c, hw), x.dtype),
        grid=(b, n_tiles),
        in_specs=[
            pl.BlockSpec((1, c, t), lambda bi, ji: (bi, 0, ji)),
            pl.BlockSpec((2, c, 1), lambda bi, ji: (0, 0, 0)),
        ],
        out_specs=pl.BlockSpec((1, c, t), lambda bi, ji: (bi, 0, ji)),
        compiler_params=pltpu.CompilerParams(
            dimension_semantics=("parallel", "parallel"),
            vmem_limit_bytes=vmem_limit),
    )(x3, params)

    return y3.reshape(b, c, h, w)


def _reference_nchw(x, weight, bias, layernorm_type):
    b, c, h, w = x.shape
    x3 = jnp.transpose(x, (0, 2, 3, 1)).reshape(b, h * w, c).astype(jnp.float32)
    mu = jnp.mean(x3, axis=-1, keepdims=True)
    var = jnp.mean((x3 - mu) ** 2, axis=-1, keepdims=True)
    if layernorm_type == "BiasFree":
        y = x3 / jnp.sqrt(var + 1e-5) * weight
    else:
        y = (x3 - mu) / jnp.sqrt(var + 1e-5) * weight + bias
    return jnp.transpose(y.reshape(b, h, w, c), (0, 3, 1, 2)).astype(x.dtype)


if __name__ == "__main__":
    key = jax.random.PRNGKey(0)
    ok = True
    # Second shape has H*W = 279 (not a multiple of 128) and a mean offset:
    # exercises the masked ragged last block and the two-pass variance.
    for (B, C, H, W), offset in (((2, 4, 16, 16), 0.0), ((1, 4, 9, 31), 2.0)):
        key, kx, kw, kb = jax.random.split(key, 4)
        x = jax.random.normal(kx, (B, C, H, W), dtype=jnp.float32) + offset
        weight = 1.0 + 0.1 * jax.random.normal(kw, (C,), dtype=jnp.float32)
        bias = 0.1 * jax.random.normal(kb, (C,), dtype=jnp.float32)
        for ln_type in ("WithBias", "BiasFree"):
            y = jax.block_until_ready(
                layernorm_nchw(x, weight, bias, layernorm_type=ln_type))
            y_ref = _reference_nchw(x, weight, bias, ln_type)
            if not jnp.allclose(y, y_ref, atol=1e-5, rtol=1e-5):
                ok = False

    if ok:
        print("KERNEL_OK")
</pallas_src>

<mosaic_0001>
module attributes {stable_mosaic.version = 11 : i64} {
  func.func @_ln_kernel(%arg0: i32, %arg1: i32, %arg2: memref<1x4x256xf32, #tpu.memory_space<vmem>>, %arg3: memref<2x4x1xf32, #tpu.memory_space<vmem>>, %arg4: memref<1x4x256xf32, #tpu.memory_space<vmem>>) attributes {dimension_semantics = [#tpu.dimension_semantics<parallel>, #tpu.dimension_semantics<parallel>], iteration_bounds = array<i64: 2, 1>, scalar_prefetch = 0 : i64, scratch_operands = 0 : i64, tpu.core_type = #tpu.core_type<tc>, window_params = [{transform_indices = @transform_0, window_bounds = array<i64: 1, 4, 256>}, {pipeline_mode = #tpu.pipeline_mode<synchronous>, transform_indices = @transform_1, window_bounds = array<i64: 2, 4, 1>}, {transform_indices = @transform_2, window_bounds = array<i64: 1, 4, 256>}]} {
    %c0 = arith.constant 0 : index
    %c0_0 = arith.constant 0 : index
    %c0_1 = arith.constant 0 : index
    %0 = vector.load %arg2[%c0, %c0_0, %c0_1] : memref<1x4x256xf32, #tpu.memory_space<vmem>>, vector<1x4x256xf32>
    %cst = arith.constant dense<0.000000e+00> : vector<1x256xf32>
    %1 = vector.multi_reduction <add>, %0, %cst [1] : vector<1x4x256xf32> to vector<1x256xf32>
    %2 = vector.shape_cast %1 : vector<1x256xf32> to vector<1x1x256xf32>
    %cst_2 = arith.constant 2.500000e-01 : f32
    %3 = vector.broadcast %cst_2 : f32 to vector<1x1x256xf32>
    %4 = arith.mulf %2, %3 : vector<1x1x256xf32>
    %5 = vector.broadcast %4 : vector<1x1x256xf32> to vector<1x4x256xf32>
    %6 = arith.subf %0, %5 : vector<1x4x256xf32>
    %7 = arith.mulf %6, %6 : vector<1x4x256xf32>
    %cst_3 = arith.constant dense<0.000000e+00> : vector<1x256xf32>
    %8 = vector.multi_reduction <add>, %7, %cst_3 [1] : vector<1x4x256xf32> to vector<1x256xf32>
    %9 = vector.shape_cast %8 : vector<1x256xf32> to vector<1x1x256xf32>
    %cst_4 = arith.constant 2.500000e-01 : f32
    %10 = vector.broadcast %cst_4 : f32 to vector<1x1x256xf32>
    %11 = arith.mulf %9, %10 : vector<1x1x256xf32>
    %cst_5 = arith.constant 9.99999974E-6 : f32
    %12 = vector.broadcast %cst_5 : f32 to vector<1x1x256xf32>
    %13 = arith.addf %11, %12 : vector<1x1x256xf32>
    %14 = math.rsqrt %13 : vector<1x1x256xf32>
    %c0_6 = arith.constant 0 : index
    %c0_7 = arith.constant 0 : index
    %c0_8 = arith.constant 0 : index
    %15 = vector.load %arg3[%c0_6, %c0_7, %c0_8] : memref<2x4x1xf32, #tpu.memory_space<vmem>>, vector<1x4x1xf32>
    %c1 = arith.constant 1 : index
    %c0_9 = arith.constant 0 : index
    %c0_10 = arith.constant 0 : index
    %16 = vector.load %arg3[%c1, %c0_9, %c0_10] : memref<2x4x1xf32, #tpu.memory_space<vmem>>, vector<1x4x1xf32>
    %17 = vector.broadcast %14 : vector<1x1x256xf32> to vector<1x4x256xf32>
    %18 = vector.broadcast %15 : vector<1x4x1xf32> to vector<1x4x256xf32>
    %19 = arith.mulf %17, %18 : vector<1x4x256xf32>
    %20 = arith.mulf %6, %19 : vector<1x4x256xf32>
    %21 = vector.broadcast %16 : vector<1x4x1xf32> to vector<1x4x256xf32>
    %22 = arith.addf %20, %21 : vector<1x4x256xf32>
    %c0_11 = arith.constant 0 : index
    %c0_12 = arith.constant 0 : index
    %c0_13 = arith.constant 0 : index
    %23 = vector.load %arg4[%c0_11, %c0_12, %c0_13] : memref<1x4x256xf32, #tpu.memory_space<vmem>>, vector<1x4x256xf32>
    tpu.vector_store %arg4[%c0_11, %c0_12, %c0_13], %22 {strides = array<i32>} : memref<1x4x256xf32, #tpu.memory_space<vmem>>, vector<1x4x256xf32>,
    return
  }
  func.func @transform_0(%arg0: i32, %arg1: i32) -> (i32, i32, i32) {
    %c0_i32 = arith.constant 0 : i32
    %c0_i32_0 = arith.constant 0 : i32
    return %arg0, %c0_i32, %arg1 : i32, i32, i32
  }
  func.func @transform_1(%arg0: i32, %arg1: i32) -> (i32, i32, i32) {
    %c0_i32 = arith.constant 0 : i32
    %c0_i32_0 = arith.constant 0 : i32
    %c0_i32_1 = arith.constant 0 : i32
    %c0_i32_2 = arith.constant 0 : i32
    return %c0_i32, %c0_i32_0, %c0_i32_1 : i32, i32, i32
  }
  func.func @transform_2(%arg0: i32, %arg1: i32) -> (i32, i32, i32) {
    %c0_i32 = arith.constant 0 : i32
    %c0_i32_0 = arith.constant 0 : i32
    return %arg0, %c0_i32, %arg1 : i32, i32, i32
  }
}

</mosaic_0001>

<bundles_post_ra>
// kernel: layernorm_nchw.1
= control target key start
LH: loop header
LB: loop body
LE: loop exit
PB: predicated region body
PF: predicated region fallthrough
CT: control target
= control target key end

     0   :  { %s436_s9 = smov 0   ;;  %s438_s10 = smov 0   ;;  %s486_s0 = inlined_call_operand.vmem [shape: f32[2,4,256], index: 0, kind: input, shape index: {}]   ;;  %s487_s1 = inlined_call_operand.vmem [shape: f32[2,4,1], index: 1, kind: input, shape index: {}]   ;;  %s488_s2 = inlined_call_operand.vmem [shape: f32[2,4,256], index: 2, kind: output, shape index: {}]  }
   0x1   :  { %s440_s11 = smov 0  }
   0x2 LB: > { %s24_s12 = sadd.s32 1, %s413_s10  ;;  %p353_p0 = scmp.ge.s32.totalorder %s417_s11, 1  ;;  %s417_s11 = sphi %s440_s11, %s12_s11   ;;  %s413_s10 = sphi %s438_s10, %s490_s10   ;;  %s409_s9 = sphi %s436_s9, %s489_s9  }
   0x3   : > { %p26_p1 = scmp.ge.s32.totalorder %s24_s12, 2  ;;  %p133_p2 = scmp.lt.s32.totalorder %s417_s11, 3 }
   0x5   : > { %s492_s12 = smov (%p26_p1, %s24_s12), 0  ;;  %p134_p3 = pnand %p353_p0, %p133_p2 }
   0x6   : > { %p164_p4 = scmp.lt.s32.totalorder (!%p134_p3), %s409_s9, 1 }
   0x7   : > { %137 = sbr.rel (%p134_p3) target bundleno = 147 (0x93), region = 28 }
   0xc   : > { %v233_v0 = vld [vmem:[%s487_s1] sm:$0xf]  ;;  %v419_v1 = vmov 0   ;;  %v358_v2 = vld [vmem:[%s487_s1 + $0x4] sm:$0xf]  ;;  %s494_s9 = smov (!%p164_p4, %s409_s9), 1  ;;  %v255_v45 = vlaneseq }
   0xd   : > { %389 = vset.pattern.permute.xlu0 %v419_v1  ;;  %s361_s17 = sshll.u32 %s494_s9, 3  ;;  %vm187_vm0 = vcmask 1043456   ;;  %v420_v43 = vmov 839922192  }
   0xe   : > { %238 = vperm.xlu0 %389, %v233_v0   ;;  %s171_s20 = scalar_lea.vmem %s486_s0, %s361_s17  ;;  %v253_v44 = vunpack.c.l.s4 %v420_v43  ;;  %v256_v48 = vshrl.u32 %v255_v45, 7  ;;  %s181_s23 = scalar_lea.vmem %s488_s2, %s361_s17 }
   0xf   : > { %v183_v3 = vld [vmem:[%s171_s20] sm:$0xff] }
  0x10   : > { %v185_v4 = vcombine.high %v183_v3, %v183_v3  ;;  %v188_v5 = vsel %vm187_vm0, %v183_v3, 0.0  ;;  %v254_v47 = vunpack.c.0.s8 %v253_v44 }
  0x11   : > { %v189_v7 = vrot.slane %v188_v5, 4 }
  0x12   : > { %250 = vperm.xlu0 %389, %v358_v2   ;;  %v195_v6 = vsel %vm187_vm0, %v185_v4, 0.0  ;;  %v257_v53 = vsub.s32 %v254_v47, %v256_v48 }
  0x13   : > { %v196_v8 = vrot.slane %v195_v6, 4  ;;  %v190_v9 = vadd.f32 %v189_v7, %v188_v5 }
  0x15   : > { %v197_v10 = vadd.f32 %v196_v8, %v195_v6  ;;  %v191_v11 = vrot.slane %v190_v9, 2 }
  0x17   : > { %v198_v12 = vrot.slane %v197_v10, 2  ;;  %v192_v13 = vadd.f32 %v191_v11, %v190_v9 }
  0x19   : > { %v199_v14 = vadd.f32 %v198_v12, %v197_v10  ;;  %v193_v15 = vrot.slane %v192_v13, 1 }
  0x1b   : > { %v200_v16 = vrot.slane %v199_v14, 1  ;;  %v194_v17 = vadd.f32 %v193_v15, %v192_v13 }
  0x1d   : > { %v201_v18 = vadd.f32 %v200_v16, %v199_v14  ;;  %v202_v19 = vmul.f32 0.25, %v194_v17 }
  0x1f   : > { %v203_v20 = vmul.f32 0.25, %v201_v18 }
  0x21   : > { %v206_v21 = vcombine.low %v202_v19, %v203_v20 }
  0x23   : > { %v208_v22 = vsub.f32 %v183_v3, %v206_v21 }
  0x25   : > { %v209_v23 = vmul.f32 %v208_v22, %v208_v22 }
  0x27   : > { %v211_v24 = vcombine.high %v209_v23, %v209_v23  ;;  %v213_v25 = vsel %vm187_vm0, %v209_v23, 0.0 }
  0x28   : > { %v214_v27 = vrot.slane %v213_v25, 4 }
  0x29   : > { %v220_v26 = vsel %vm187_vm0, %v211_v24, 0.0 }
  0x2a   : > { %v221_v28 = vrot.slane %v220_v26, 4  ;;  %v215_v29 = vadd.f32 %v214_v27, %v213_v25 }
  0x2c   : > { %v222_v30 = vadd.f32 %v221_v28, %v220_v26  ;;  %v216_v31 = vrot.slane %v215_v29, 2 }
  0x2e   : > { %v223_v32 = vrot.slane %v222_v30, 2  ;;  %v217_v33 = vadd.f32 %v216_v31, %v215_v29 }
  0x30   : > { %v224_v34 = vadd.f32 %v223_v32, %v222_v30  ;;  %v218_v35 = vrot.slane %v217_v33, 1 }
  0x32   : > { %v225_v36 = vrot.slane %v224_v34, 1  ;;  %v219_v37 = vadd.f32 %v218_v35, %v217_v33 }
  0x34   : > { %v226_v38 = vadd.f32 %v225_v36, %v224_v34  ;;  %v227_v39 = vmul.f32 0.25, %v219_v37 }
  0x36   : > { %v228_v40 = vmul.f32 0.25, %v226_v38  ;;  %v229_v41 = vadd.f32 1e-05, %v227_v39 }
  0x38   : > { %v230_v42 = vadd.f32 1e-05, %v228_v40  ;;  %391 = vrsqrt.f32 %v229_v41 }
  0x3a   : > { %393 = vrsqrt.f32 %v230_v42 }
  0x45   : > { %v392_v46 = vpop.eup %391 }
  0x47   : > { %v394_v49 = vpop.eup %393 }
  0x89   : > { %v239_v50 = vpop.permute.xlu0 %238 }
  0x8a   : > { %v241_v51 = vmul.f32 %v392_v46, %v239_v50  ;;  %v242_v52 = vmul.f32 %v394_v49, %v239_v50 }
  0x8c   : > { %v245_v54 = vcombine.low %v241_v51, %v242_v52 }
  0x8d   : > { %v251_v55 = vpop.permute.xlu0 %250 }
  0x8e   : > { %v247_v56 = vmul.f32 %v245_v54, %v208_v22  ;;  %v258_v57 = vrot.slane %v251_v55, %v257_v53 }
  0x90   : > { %v260_v58 = vadd.f32 %v258_v57, %v247_v56 }
  0x92   : > { %261 = vst [vmem:[%s181_s23] sm:$0xff] %v260_v58 }
  0x93 PF: > { %s12_s11 = sadd.s32 1, %s417_s11   ;;  %s489_s9 = smov %s413_s10 }
  0x94   : > { %p9_p5 = scmp.ge.s32.totalorder %s12_s11, 4   ;;  %s490_s10 = smov %s492_s12 }
  0x96   :  { %11 = sbr.rel (!%p9_p5) target bundleno = 2 (0x2), region = 59 }

</bundles_post_ra>
